<compile_context>
chip_gen: v7x
topology: tpu7x:2x2x1
jax: 0.10.0
libtpu: 0.0.40
codegen_flags: <defaults>
</compile_context>

<pallas_src>
import functools

import jax
import jax.numpy as jnp
from jax.experimental import pallas as pl
from jax.experimental.pallas import tpu as pltpu

_LANE = 128


def _round_up(n: int, m: int) -> int:
    return ((n + m - 1) // m) * m


def _choose_tiles(B: int, T: int, itemsize: int, tile_t=None):
    """Pick (TILE_B, TILE_T).

    Target ~2 MiB per x block (>=85% of HBM roofline per measured tile-size
    curve) while keeping the pipelined footprint (in + out, double-buffered,
    ~4 * TILE_B * TILE_T * itemsize) under ~12 MiB so v5e's 16 MiB default
    scoped VMEM (and v6e/v7x's 32 MiB) is never exceeded.
    """
    tile_b = B if B <= 512 else 512          # 512 is a multiple of 8 (sublanes)
    max_tile_t = _round_up(T, _LANE)
    if tile_t is not None:
        return tile_b, min(_round_up(tile_t, _LANE), max_tile_t)
    target_block_bytes = 2 << 20
    vmem_budget_bytes = 12 << 20
    by_target = (target_block_bytes // (tile_b * itemsize)) // _LANE * _LANE
    by_vmem = (vmem_budget_bytes // (4 * tile_b * itemsize)) // _LANE * _LANE
    tile_t_sel = max(_LANE, min(by_target, by_vmem))
    return tile_b, min(tile_t_sel, max_tile_t)


def _preemphasis_kernel(bp_ref, x_ref, o_ref, *, coef):
    """One (TILE_B, TILE_T) tile of the pre-emphasis filter.

    bp_ref holds, per T-tile, the sample preceding that tile's first column
    (reflect pad makes it x[:, 1] for the first tile), so there is no
    sequential carry and both grid axes are parallel.
    """
    t = pl.program_id(1)
    x = x_ref[...]                                        # (TILE_B, TILE_T)

    # Select this T-tile's boundary-prev column (VALU select + XLU reduce).
    bp = bp_ref[...]                                      # (TILE_B, NUM_T_TILES)
    tile_col = jax.lax.broadcasted_iota(jnp.int32, bp.shape, 1)
    first_prev = jnp.sum(jnp.where(tile_col == t, bp, 0.0),
                         axis=1, keepdims=True)           # (TILE_B, 1)

    prev = pltpu.roll(x, shift=1, axis=1)                 # prev[:, j] = x[:, j-1]
    lane = jax.lax.broadcasted_iota(jnp.int32, x.shape, 1)
    prev = jnp.where(lane == 0, first_prev, prev)         # in-register col-0 fix
    o_ref[...] = x - coef * prev                          # single unmasked store


def preemphasis(x: jax.Array, coef: float = 0.97, tile_t=None) -> jax.Array:
    """x: (B, T) float32 -> (B, T) float32 (same semantics as the torch module)."""
    B, T = x.shape
    if T < 2:
        # TODO(synk): PyTorch reflect pad errors for T < 2; mirror that here.
        raise ValueError("PreEmphasis (reflect pad) requires T >= 2.")

    itemsize = x.dtype.itemsize
    tile_b, tile = _choose_tiles(B, T, itemsize, tile_t)
    num_b_tiles = pl.cdiv(B, tile_b)
    num_t_tiles = pl.cdiv(T, tile)

    # Boundary-prev: prev of each T-tile's first column.  O(B * num_t_tiles)
    # bytes -- negligible against the 2*B*T*itemsize roofline.
    t_idx = jnp.arange(num_t_tiles, dtype=jnp.int32) * tile - 1
    t_idx = t_idx.at[0].set(1)                            # reflect: y[0] = x[0] - coef*x[1]
    boundary_prev = jnp.take(x, t_idx, axis=1)            # (B, num_t_tiles)

    # TODO(synk): for production B < 8, fold each row's time axis into 8
    # sublanes ((B, T) -> (8*B, T/8) view plus the same boundary-prev trick)
    # to fill vregs; omitted to keep the ragged-T path simple.
    # NOTE: pass input_output_aliases={1: 0} when the caller can donate x
    # (halves peak HBM footprint); omitted here so main() can reuse x.
    kernel = functools.partial(_preemphasis_kernel, coef=coef)
    return pl.pallas_call(
        kernel,
        out_shape=jax.ShapeDtypeStruct((B, T), x.dtype),
        grid=(num_b_tiles, num_t_tiles),
        in_specs=[
            pl.BlockSpec((tile_b, num_t_tiles), lambda b, t: (b, 0)),
            pl.BlockSpec((tile_b, tile), lambda b, t: (b, t)),
        ],
        out_specs=pl.BlockSpec((tile_b, tile), lambda b, t: (b, t)),
        compiler_params=pltpu.CompilerParams(
            # No cross-tile carry -> both axes are megacore-shardable.
            dimension_semantics=("parallel", "parallel"),
        ),
        cost_estimate=pl.CostEstimate(
            flops=2 * B * T,
            transcendentals=0,
            bytes_accessed=2 * B * T * itemsize,
        ),
    )(boundary_prev, x)


def preemphasis_ref(x: jax.Array, coef: float = 0.97) -> jax.Array:
    """Pure-JAX reference replicating the PyTorch reflect-pad + conv1d."""
    padded = jnp.concatenate([x[:, 1:2], x], axis=1)      # reflect pad (1, 0)
    return padded[:, 1:] - coef * padded[:, :-1]


if __name__ == "__main__":
    coef = 0.97
    key = jax.random.PRNGKey(0)
    k1, k2 = jax.random.split(key)

    # Multi-tile case with a ragged last T block (1000 = 3*256 + 232):
    # exercises the cdiv/no-pad path and the boundary-prev columns.
    B, T = 2, 1000
    x = jax.random.normal(k1, (B, T), dtype=jnp.float32)
    out = jax.block_until_ready(preemphasis(x, coef=coef, tile_t=256))
    ref = preemphasis_ref(x, coef=coef)
    assert out.shape == (B, T), out.shape
    assert jnp.allclose(out, ref, atol=1e-6, rtol=1e-6), "multi-tile mismatch"

    # Single-tile case with automatic (byte-budgeted) tile selection.
    B2, T2 = 4, 384
    x2 = jax.random.normal(k2, (B2, T2), dtype=jnp.float32)
    out2 = jax.block_until_ready(preemphasis(x2, coef=coef))
    ref2 = preemphasis_ref(x2, coef=coef)
    assert out2.shape == (B2, T2), out2.shape
    assert jnp.allclose(out2, ref2, atol=1e-6, rtol=1e-6), "single-tile mismatch"

    print("KERNEL_OK")
</pallas_src>

<mosaic_0001>
module attributes {stable_mosaic.version = 11 : i64} {
  func.func @_preemphasis_kernel(%arg0: i32, %arg1: i32, %arg2: memref<2x4xf32, #tpu.memory_space<vmem>>, %arg3: memref<2x256xf32, #tpu.memory_space<vmem>>, %arg4: memref<2x256xf32, #tpu.memory_space<vmem>>) attributes {dimension_semantics = [#tpu.dimension_semantics<parallel>, #tpu.dimension_semantics<parallel>], iteration_bounds = array<i64: 1, 4>, scalar_prefetch = 0 : i64, scratch_operands = 0 : i64, tpu.core_type = #tpu.core_type<tc>, window_params = [{transform_indices = @transform_0, window_bounds = array<i64: 2, 4>}, {transform_indices = @transform_1, window_bounds = array<i64: 2, 256>}, {transform_indices = @transform_2, window_bounds = array<i64: 2, 256>}]} {
    %c0 = arith.constant 0 : index
    %c0_0 = arith.constant 0 : index
    %0 = vector.load %arg3[%c0, %c0_0] : memref<2x256xf32, #tpu.memory_space<vmem>>, vector<2x256xf32>
    %c0_1 = arith.constant 0 : index
    %c0_2 = arith.constant 0 : index
    %1 = vector.load %arg2[%c0_1, %c0_2] : memref<2x4xf32, #tpu.memory_space<vmem>>, vector<2x4xf32>
    %2 = tpu.iota {dimensions = array<i32: 1>} : vector<2x4xi32>
    %3 = vector.broadcast %arg1 : i32 to vector<2x4xi32>
    %4 = arith.cmpi eq, %2, %3 : vector<2x4xi32>
    %cst = arith.constant 0.000000e+00 : f32
    %5 = vector.broadcast %cst : f32 to vector<2x4xf32>
    %6 = arith.select %4, %1, %5 : vector<2x4xi1>, vector<2x4xf32>
    %cst_3 = arith.constant dense<0.000000e+00> : vector<2xf32>
    %7 = vector.multi_reduction <add>, %6, %cst_3 [1] : vector<2x4xf32> to vector<2xf32>
    %8 = vector.shape_cast %7 : vector<2xf32> to vector<2x1xf32>
    %c1_i32 = arith.constant 1 : i32
    %9 = tpu.dynamic_rotate %0 by %c1_i32 dim 1 : vector<2x256xf32>, i32 -> vector<2x256xf32>
    %10 = tpu.iota {dimensions = array<i32: 1>} : vector<2x256xi32>
    %c0_i32 = arith.constant 0 : i32
    %11 = vector.broadcast %c0_i32 : i32 to vector<2x256xi32>
    %12 = arith.cmpi eq, %10, %11 : vector<2x256xi32>
    %13 = vector.shape_cast %8 : vector<2x1xf32> to vector<2x1xf32>
    %14 = vector.broadcast %13 : vector<2x1xf32> to vector<2x256xf32>
    %15 = arith.select %12, %14, %9 : vector<2x256xi1>, vector<2x256xf32>
    %cst_4 = arith.constant 9.700000e-01 : f32
    %16 = vector.broadcast %cst_4 : f32 to vector<2x256xf32>
    %17 = arith.mulf %16, %15 : vector<2x256xf32>
    %18 = arith.subf %0, %17 : vector<2x256xf32>
    %c0_5 = arith.constant 0 : index
    %c0_6 = arith.constant 0 : index
    %19 = vector.load %arg4[%c0_5, %c0_6] : memref<2x256xf32, #tpu.memory_space<vmem>>, vector<2x256xf32>
    tpu.vector_store %arg4[%c0_5, %c0_6], %18 {strides = array<i32>} : memref<2x256xf32, #tpu.memory_space<vmem>>, vector<2x256xf32>,
    return
  }
  func.func @transform_0(%arg0: i32, %arg1: i32) -> (i32, i32) {
    %c0_i32 = arith.constant 0 : i32
    %c0_i32_0 = arith.constant 0 : i32
    return %arg0, %c0_i32 : i32, i32
  }
  func.func @transform_1(%arg0: i32, %arg1: i32) -> (i32, i32) {
    %c0_i32 = arith.constant 0 : i32
    return %arg0, %arg1 : i32, i32
  }
  func.func @transform_2(%arg0: i32, %arg1: i32) -> (i32, i32) {
    %c0_i32 = arith.constant 0 : i32
    return %arg0, %arg1 : i32, i32
  }
}

</mosaic_0001>

<bundles_post_ra>
// kernel: tpu_custom_call.1
= control target key start
LH: loop header
LB: loop body
LE: loop exit
PB: predicated region body
PF: predicated region fallthrough
CT: control target
= control target key end

     0   :  { %7 = vsyncpa [#allocation3], 0  ;;  %s843_s0 = inlined_call_operand.hbm [shape: f32[2,4], index: 0, kind: input, shape index: {}]   ;;  %s844_s1 = inlined_call_operand.hbm [shape: f32[2,1000], index: 1, kind: input, shape index: {}]   ;;  %s845_s2 = inlined_call_operand.hbm [shape: f32[2,1000], index: 2, kind: output, shape index: {}]  }
   0x1   :  { %8 = vsyncpa [#allocation6], 0 }
   0x2   :  { %10 = vsyncpa [#allocation6 + $0x1], 0 }
   0x3   :  { %11 = vsyncpa [#allocation4], 0 }
   0x4   :  { %13 = vsyncpa [#allocation4 + $0x1], 0  ;;  %s624_s9 = smov 0   ;;  %s626_s10 = smov 0  }
   0x5   :  { %s628_s11 = smov 0   ;;  %s630_s12 = smov 0  }
   0x6   :  { %s632_s13 = smov 0   ;;  %s634_s14 = smov 0  }
   0x7 LB: > { %s364_s15 = sadd.s32 4294967295, %s602_s14   ;;  %s365_s16 = sadd.s32 4294967294, %s602_s14   ;;  %s602_s14 = sphi %s634_s14, %s19_s14   ;;  %s598_s13 = sphi %s632_s13, %s869_s13   ;;  %s594_s12 = sphi %s630_s12, %s868_s12   ;;  %s590_s11 = sphi %s628_s11, %s867_s11   ;;  %s586_s10 = sphi %s626_s10, %s866_s10   ;;  %s582_s9 = sphi %s624_s9, %s865_s9  }
   0x8   : > { %p79_p0 = scmp.ne.s32.totalorder %s586_s10, %s582_s9  ;;  %p658_p1 = scmp.eq.s32.totalorder %s364_s15, 0 }
   0x9   : > { %p662_p2 = scmp.eq.s32.totalorder %s364_s15, 3  ;;  %p111_p3 = scmp.eq.s32.totalorder %s365_s16, 3 }
   0xa   : > { %s850_s17 = scalar_select %p658_p1, 1, 0 }
   0xb   : > { %s851_s18 = scalar_select %p662_p2, 1, 0 }
   0xc   : > { %p668_p4 = por %p658_p1, %p79_p0  ;;  %p366_p5 = scmp.ge.s32.totalorder %s602_s14, 1 }
   0xd   : > { %p673_p6 = por %p111_p3, %p79_p0  ;;  %p118_p7 = scmp.lt.s32.totalorder %s602_s14, 5 }
   0xe   : > { %s852_s19 = scalar_select %p668_p4, 1, 0 }
   0xf   : > { %s853_s20 = scalar_select %p673_p6, 1, 0 }
  0x10   : > { %p678_p8 = pnand %p366_p5, %p118_p7  ;;  %s604_s22 = smov [#allocation2]  }
  0x11   : > { %s133_s23 = sshll.u32 %s604_s22, 4  ;;  %s28_s25 = sadd.s32 1, %s598_s13  ;;  %s134_s23 = int_to_ptr.vmem [resolvable:$true] %s133_s23 }
  0x12   : > { %s854_s21 = scalar_select %p678_p8, 1, 0 }
  0x13   : > { %p391_p9 = pneg %p678_p8  ;;  %s66_s26 = sadd.s32 1, %s590_s11 }
  0x14   : > { %p692_p11 = scmp.ge.s32.totalorder %s28_s25, 4  ;;  %s458_s30 = scalar_lea.hbm %s843_s0, 32 }
  0x15   : > { %p686_p10 = pnand %p391_p9, %p658_p1  ;;  %p459_p12 = scmp.ne.s32.totalorder %s843_s0, %s458_s30 }
  0x16   : > { %s856_s27 = scalar_select %p692_p11, 1, 0 }
  0x17   : > { %p460_p13 = pneg %p686_p10  ;;  %p465_p5 = scmp.lt.u32.totalorder %s458_s30, %s843_s0 }
  0x19   : > { %p461_p0 = pnand %p460_p13, %p459_p12 }
  0x1b   : > { %p462_p3 = pneg %p461_p0 }
  0x1d   : > { %p467_p7 = pnand %p465_p5, %p462_p3 }
  0x1f   : > { %470 = shalt.err (!%p467_p7)
}
  0x20   : > { %s471_s7 = scalar_lea.vmem %s134_s23, 32  ;;  %p479_p1 = scmp.lt.s32.totalorder %s134_s23, %s134_s23 }
  0x21   : > { %p472_p9 = scmp.ne.s32.totalorder %s134_s23, %s471_s7  ;;  %p480_p8 = scmp.lt.s32.totalorder %s471_s7, %s471_s7 }
  0x23   : > { %p474_p6 = pnand %p472_p9, %p460_p13  ;;  %p481_p2 = por %p480_p8, %p479_p1 }
  0x25   : > { %p475_p4 = pneg %p474_p6 }
  0x27   : > { %p482_p11 = pnand %p481_p2, %p475_p4 }
  0x29   : > { %485 = shalt.err (!%p482_p11)
}
  0x2a   : > { %394 = dma.hbm_to_vmem [thread:$0]  (!%p686_p10), %s843_s0, 32, %s134_s23, [#allocation3]  }
  0x2b   : > { %p857_p1 = scmp.ne.s32.totalorder %s856_s27, 0  ;;  %p73_p2 = scmp.ne.s32.totalorder %s590_s11, %s586_s10 }
  0x2c   : > { %p74_p4 = scmp.eq.s32.totalorder %s602_s14, 0  ;;  %p404_p6 = scmp.lt.s32.totalorder %s602_s14, 4 }
  0x2d   : > { %s871_s25 = smov (%p857_p1, %s28_s25), 0  ;;  %p858_p12 = scmp.ne.s32.totalorder %s851_s18, 0 }
  0x2e   : > { %s62_s16 = ssub.s32 %s598_s13, %s871_s25  ;;  %p75_p11 = por %p74_p4, %p73_p2 }
  0x2f   : > { %p64_p8 = scmp.eq.s32.totalorder %s62_s16, 0  ;;  %p724_p13 = por %p858_p12, %p73_p2 }
  0x30   : > { %s144_s24 = sand.u32 1, %s590_s11   ;;  %s381_s27 = sshll.u32 %s598_s13, 6 }
  0x31   : > { %s732_s28 = scalar_select %p64_p8, %s590_s11, %s66_s26  }
  0x32   : > { %s369_s23 = sshll.u32 %s144_s24, 2  ;;  %s738_s3 = scalar_lea.hbm %s844_s1, %s381_s27 }
  0x33   : > { %s148_s18 = scalar_lea.vmem [#allocation5], %s369_s23  ;;  %p742_p10 = pnand %p404_p6, %p75_p11 }
  0x34   : > { %s158_s4 = sshll.u32 %s148_s18, 4  ;;  %s145_s26 = scalar_lea.sflag [#allocation6], %s144_s24  ;;  %s740_s4 = int_to_ptr.vmem [resolvable:$true] %s158_s4 }
  0x35   : > { %s486_s6 = scalar_lea.hbm %s738_s3, 64  ;;  %p488_p3 = pneg %p742_p10 }
  0x36   : > { %p487_p0 = scmp.ne.s32.totalorder %s738_s3, %s486_s6  ;;  %s491_s15 = scalar_lea.hbm %s844_s1, 256 }
  0x37   : > { %p492_p9 = scmp.lt.u32.totalorder %s738_s3, %s844_s1  ;;  %p493_p1 = scmp.lt.u32.totalorder %s491_s15, %s486_s6 }
  0x38   : > { %p489_p5 = pnand %p488_p3, %p487_p0  ;;  %p495_p4 = scmp.lt.u32.totalorder %s486_s6, %s738_s3 }
  0x39   : > { %p494_p2 = por %p493_p1, %p492_p9 }
  0x3a   : > { %p490_p7 = pneg %p489_p5 }
  0x3b   : > { %p496_p6 = por %p495_p4, %p494_p2 }
  0x3d   : > { %p497_p8 = pnand %p496_p6, %p490_p7 }
  0x3f   : > { %500 = shalt.err (!%p497_p8)
}
  0x40   : > { %s501_s24 = scalar_lea.vmem %s740_s4, 64  ;;  %s605_s27 = smov [#allocation5]  }
  0x41   : > { %p502_p11 = scmp.ne.s32.totalorder %s740_s4, %s501_s24  ;;  %s506_s29 = sshll.u32 %s605_s27, 4  ;;  %s507_s29 = int_to_ptr.vmem [resolvable:$false] %s506_s29 }
  0x42   : > { %s508_s30 = scalar_lea.vmem %s507_s29, 128  ;;  %p509_p5 = scmp.lt.s32.totalorder %s740_s4, %s507_s29 }
  0x43   : > { %p504_p12 = pnand %p502_p11, %p488_p3  ;;  %p510_p9 = scmp.lt.s32.totalorder %s508_s30, %s501_s24 }
  0x45   : > { %p505_p0 = pneg %p504_p12  ;;  %p511_p1 = por %p510_p9, %p509_p5 }
  0x47   : > { %p512_p2 = pnand %p511_p1, %p505_p0 }
  0x49   : > { %515 = shalt.err (!%p512_p2)
}
  0x4a   : > { %398 = dma.hbm_to_vmem [thread:$0]  (!%p742_p10), %s738_s3, 64, %s740_s4, %s145_s26  }
  0x4b   : > { %p861_p7 = scmp.ne.s32.totalorder %s854_s21, 0 }
  0x4c   : > { %p862_p3 = scmp.ne.s32.totalorder (!%p861_p7), %s850_s17, 0 }
  0x4d   : > { %167 = sbr.rel (%p861_p7) target bundleno = 266 (0x10a), region = 28 }
  0x54   : > { %569 = dma.done.wait (%p862_p3), [#allocation3], 32  }
  0x55   : > { %571 = vsyncadd (%p862_p3), [#allocation3], 4294967264  ;;  %s778_s18 = sand.u32 1, %s586_s10   ;;  %p863_p10 = scmp.ne.s32.totalorder %s852_s19, 0 }
  0x56   : > { %s374_s5 = sshll.u32 %s778_s18, 2  ;;  %s174_s6 = scalar_lea.sflag [#allocation6], %s778_s18 }
  0x57   : > { %s177_s3 = scalar_lea.vmem [#allocation5], %s374_s5 }
  0x58   : > { %573 = dma.done.wait (%p863_p10), %s174_s6, 64  }
  0x59   : > { %575 = vsyncadd (%p863_p10), %s174_s6, 4294967232  ;;  %v202_v0 = vlaneseq  ;;  %v606_v1 = vmov 1983009808   ;;  %v204_v4 = vstv %s594_s12  ;;  %vm207_vm1 = vcmask 25600   ;;  %v201_v8 = vld [vmem:[#allocation2] sm:$0x3] }
  0x5a   : > { %v213_v2 = vunpack.c.l.s4 %v606_v1  ;;  %v200_v9 = vld [vmem:[%s177_s3] sm:$0xf]  ;;  %s607_s17 = smov 1   ;;  %s382_s19 = sshll.u32 %s594_s12, 6 }
  0x5b   : > { %v203_v3 = vand.u32 127, %v202_v0  ;;  %v216_v5 = vshrl.u32 %v202_v0, 7  ;;  %s197_s21 = scalar_lea.vmem [#allocation7], %s374_s5  ;;  %s795_s8 = scalar_lea.hbm %s845_s2, %s382_s19 }
  0x5c   : > { %v214_v6 = vunpack.c.0.s8 %v213_v2  ;;  %s266_s4 = sshll.u32 %s197_s21, 4  ;;  %s250_s15 = scalar_lea.sflag [#allocation4], %s778_s18  ;;  %s797_s4 = int_to_ptr.vmem [resolvable:$true] %s266_s4 }
  0x5d   : > { %vm205_vm0 = vcmp.eq.s32.totalorder %v203_v3, %v204_v4  ;;  %vm226_vm2 = vcmp.lt.s32.totalorder %v203_v3, 1  ;;  %vm230_vm3 = vcmp.eq.s32.totalorder %v203_v3, 0  ;;  %s516_s16 = scalar_lea.vmem %s797_s4, 64  ;;  %s608_s12 = smov [#allocation7]  }
  0x5e   : > { %v217_v7 = vsub.s32 %v214_v6, %v216_v5  ;;  %v206_v10 = vsel %vm205_vm0, %v201_v8, 0.0  ;;  %p517_p4 = scmp.ne.s32.totalorder %s797_s4, %s516_s16  ;;  %s520_s23 = sshll.u32 %s608_s12, 4  ;;  %s521_s23 = int_to_ptr.vmem [resolvable:$false] %s520_s23 }
  0x5f   : > { %v208_v12 = vsel %vm207_vm1, %v206_v10, 0.0  ;;  %s522_s24 = scalar_lea.vmem %s521_s23, 128  ;;  %p523_p11 = scmp.lt.s32.totalorder %s797_s4, %s521_s23 }
  0x60   : > { %v218_v11 = vrot.slane %v200_v9, %v217_v7  ;;  %209 = vadd.xlane.f32.xlu0 %v208_v12  ;;  %p518_p6 = pnand %p517_p4, %p724_p13  ;;  %p524_p12 = scmp.lt.s32.totalorder %s522_s24, %s516_s16 }
  0x62   : > { %v219_v13 = vcombine.high %v218_v11, %v218_v11  ;;  %p519_p8 = pneg %p518_p6  ;;  %p525_p0 = por %p524_p12, %p523_p11 }
  0x64   : > { %224 = vrot.lane.b32.xlu1 %v219_v13, %s607_s17  ;;  %p526_p5 = pnand %p525_p0, %p519_p8 }
  0x76   : > { %222 = vrot.lane.b32.xlu0 %v218_v11, %s607_s17 }
  0xd6   : > { %v225_v15 = vpop.permute.xlu1 %224 }
  0xed   : > { %v210_v14 = vpop.xlane.xlu0 %209 }
  0xf1   : > { %v223_v16 = vpop.permute.xlu0 %222 }
  0xf2   : > { %v227_v17 = vsel %vm226_vm2, %v223_v16, %v225_v15  ;;  %v228_v18 = vsel %vm226_vm2, %v225_v15, %v223_v16 }
  0xf3   : > { %v232_v19 = vsel %vm230_vm3, %v210_v14, %v228_v18  ;;  %v235_v20 = vmul.f32 0.97, %v227_v17 }
  0xf4   : > { %v234_v21 = vmul.f32 0.97, %v232_v19 }
  0xf6   : > { %v238_v22 = vcombine.low %v234_v21, %v235_v20 }
  0xf8   : > { %v245_v23 = vrot.slane %v238_v22, %v217_v7 }
  0xfa   : > { %v247_v24 = vsub.f32 %v200_v9, %v245_v23 }
  0xfc   : > { %248 = vst [vmem:[%s197_s21] sm:$0xf] %v247_v24 }
  0xfd   : > { %529 = shalt.err (!%p526_p5)
}
  0xfe   : > { %s530_s27 = scalar_lea.hbm %s795_s8, 64  ;;  %s534_s18 = scalar_lea.hbm %s845_s2, 256 }
  0xff   : > { %p531_p9 = scmp.ne.s32.totalorder %s795_s8, %s530_s27  ;;  %p535_p7 = scmp.lt.u32.totalorder %s795_s8, %s845_s2 }
 0x100   : > { %p536_p3 = scmp.lt.u32.totalorder %s534_s18, %s530_s27  ;;  %p538_p4 = scmp.lt.u32.totalorder %s530_s27, %s795_s8 }
 0x101   : > { %p532_p1 = pnand %p531_p9, %p724_p13 }
 0x102   : > { %p537_p10 = por %p536_p3, %p535_p7 }
 0x103   : > { %p533_p2 = pneg %p532_p1 }
 0x104   : > { %p539_p6 = por %p538_p4, %p537_p10 }
 0x106   : > { %p540_p8 = pnand %p539_p6, %p533_p2 }
 0x108   : > { %543 = shalt.err (!%p540_p8)
}
 0x109   : > { %389 = dma.vmem_to_hbm [thread:$0]  (%p724_p13), %s797_s4, 64, %s795_s8, %s250_s15  }
 0x10a PF: > { %p406_p11 = scmp.ge.s32.totalorder %s602_s14, 2  ;;  %s278_s3 = sand.u32 1, %s582_s9  }
 0x10b   : > { %p864_p12 = scmp.ne.s32.totalorder %s853_s20, 0  ;;  %s279_s17 = scalar_lea.sflag [#allocation4], %s278_s3 }
 0x10d   : > { %p400_p0 = pnand %p406_p11, %p864_p12 }
 0x10f   : > { %577 = dma.done.wait (!%p400_p0), %s279_s17, 64  }
 0x110   : > { %579 = vsyncadd (!%p400_p0), %s279_s17, 4294967232  ;;  %s19_s14 = sadd.s32 1, %s602_s14   ;;  %s865_s9 = smov %s586_s10 }
 0x111   : > { %p16_p5 = scmp.ge.s32.totalorder %s19_s14, 6   ;;  %s866_s10 = smov %s590_s11 }
 0x112   : > { %s867_s11 = smov %s732_s28  ;;  %s868_s12 = smov %s598_s13 }
 0x113   : > { %s869_s13 = smov %s871_s25  ;;  %18 = sbr.rel (!%p16_p5) target bundleno = 7 (0x7), region = 79 }
 0x11a   :  { %284 = vsyncpa [#allocation3], 1 }
 0x11b   :  { %286 = vsyncpa [#allocation3 + $0x1], 1 }
 0x11c   :  { %287 = vsyncpa [#allocation6], 1 }
 0x11d   :  { %289 = vsyncpa [#allocation6 + $0x1], 1 }
 0x11e   :  { %290 = vsyncpa [#allocation4], 1 }
 0x11f   :  { %292 = vsyncpa [#allocation4 + $0x1], 1 }

</bundles_post_ra>
